<compile_context>
chip_gen: v7x
topology: tpu7x:2x2x1
jax: 0.10.0
libtpu: 0.0.40
codegen_flags: <defaults>
</compile_context>

<pallas_src>
import functools

import jax
import jax.numpy as jnp
from jax.experimental import pallas as pl
from jax.experimental.pallas import tpu as pltpu


def _patch_embed_kernel(x_ref, w_ref, b_ref, o_ref):
    # x_ref: (tm, K) patch rows (bf16); w_ref: (K, tn) flattened conv weight
    # (VMEM-resident when tn == E); b_ref: (1, tn) f32 bias; o_ref: (tm, tn).
    acc = jnp.dot(x_ref[...], w_ref[...], preferred_element_type=jnp.float32)
    o_ref[...] = (acc + b_ref[...]).astype(o_ref.dtype)


def patch_embed_3d(x, weight, bias, *, patch_size, temporal_stride,
                   compute_dtype=jnp.bfloat16, out_dtype=None,
                   tm_max=512, tn_max=512,
                   vmem_budget_bytes=24 * 1024 * 1024):
    """PatchEmbed3D forward.

    x:      (B, C, T, H, W)    -- PyTorch NCTHW layout
    weight: (E, C, kt, kh, kw) -- Conv3d weight with stride == kernel_size
    bias:   (E,)
    returns (B, N, E), N = (T//kt) * (H//kh) * (W//kw)
    """
    B, C, T, H, W = x.shape
    ph, pw = patch_size
    kt = int(temporal_stride)
    E = weight.shape[0]
    assert T % kt == 0 and H % ph == 0 and W % pw == 0
    Tp, Hp, Wp = T // kt, H // ph, W // pw
    N = Tp * Hp * Wp
    K = C * kt * ph * pw
    M = B * N
    out_dtype = x.dtype if out_dtype is None else out_dtype
    cd_bytes = jnp.dtype(compute_dtype).itemsize
    out_bytes = jnp.dtype(out_dtype).itemsize

    # --- im2col (layout glue): a single bf16 materialization of the patch
    # matrix; XLA fuses the f32->bf16 convert into the transpose.
    xp = x.astype(compute_dtype).reshape(B, C, Tp, kt, Hp, ph, Wp, pw)
    xp = xp.transpose(0, 2, 4, 6, 1, 3, 5, 7).reshape(M, K)   # (M, K)
    w_flat = weight.reshape(E, K).T.astype(compute_dtype)     # (K, E)
    b_flat = bias.astype(jnp.float32).reshape(1, E)           # (1, E)

    # --- tile selection -----------------------------------------------------
    # Weight residency: keep the whole (K, E) weight in VMEM (fetched once)
    # whenever its double-buffered footprint fits half the budget.
    if 2 * K * E * cd_bytes <= vmem_budget_bytes // 2 or E <= 128:
        tn = E                                           # resident weight path
    else:
        tn = min(tn_max, max(128, (E // 128) * 128))     # fallback: tile over E
    w_bytes = 2 * K * tn * cd_bytes
    bias_bytes = 2 * tn * 4

    remaining = max(vmem_budget_bytes - w_bytes - bias_bytes, 1 << 20)
    per_row = 2 * K * cd_bytes + 2 * tn * out_bytes      # x + out, double-buffered
    tm_budget = max(remaining // per_row, 8)
    if M <= min(tm_max, tm_budget):
        tm = M                                           # single full-extent row block
    else:
        tm = max(128, min(tm_max, (tm_budget // 128) * 128))

    # Grid: (E-blocks, M-blocks); M is the innermost (streaming) axis, so the
    # weight/bias block index is constant across it (fetched once when tn==E).
    grid = (pl.cdiv(E, tn), pl.cdiv(M, tm))

    vmem_est = (2 * tm * K * cd_bytes + w_bytes + 2 * tm * tn * out_bytes
                + bias_bytes)
    vmem_limit = int(min(100 * 2**20, max(24 * 2**20, vmem_est + 4 * 2**20)))

    out = pl.pallas_call(
        _patch_embed_kernel,
        out_shape=jax.ShapeDtypeStruct((M, E), out_dtype),
        grid=grid,
        in_specs=[
            pl.BlockSpec((tm, K), lambda j, i: (i, 0)),   # patch rows (streamed)
            pl.BlockSpec((K, tn), lambda j, i: (0, j)),   # weight (resident when tn == E)
            pl.BlockSpec((1, tn), lambda j, i: (0, j)),   # bias (resident)
        ],
        out_specs=pl.BlockSpec((tm, tn), lambda j, i: (i, j)),
        compiler_params=pltpu.CompilerParams(
            dimension_semantics=("parallel", "parallel"),
            vmem_limit_bytes=vmem_limit,
        ),
    )(xp, w_flat, b_flat)

    return out.reshape(B, N, E)


if __name__ == "__main__":
    # Small shapes consistent with the module:
    #   img_size=16, patch_size=8, in_chans=4, embed_dim=32,
    #   num_frames=8, temporal_stride=2
    B, C, T, H, W = 2, 4, 8, 16, 16
    ph = pw = 8
    kt = 2
    E = 32

    key = jax.random.PRNGKey(0)
    kx, kw, kb = jax.random.split(key, 3)
    x = jax.random.normal(kx, (B, C, T, H, W), dtype=jnp.float32)
    weight = jax.random.normal(kw, (E, C, kt, ph, pw), dtype=jnp.float32) * 0.02
    bias = jax.random.normal(kb, (E,), dtype=jnp.float32) * 0.02

    fwd = jax.jit(functools.partial(
        patch_embed_3d, patch_size=(ph, pw), temporal_stride=kt))
    out = jax.block_until_ready(fwd(x, weight, bias))

    # Reference: lax.conv_general_dilated (same semantics as Conv3d), f32.
    ref = jax.lax.conv_general_dilated(
        x, weight,
        window_strides=(kt, ph, pw), padding="VALID",
        dimension_numbers=("NCDHW", "OIDHW", "NCDHW"),
    ) + bias.reshape(1, E, 1, 1, 1)
    ref = ref.reshape(B, E, -1).transpose(0, 2, 1)       # (B, N, E)

    N = (T // kt) * (H // ph) * (W // pw)
    assert out.shape == (B, N, E)
    # bf16 matmul inputs with f32 accumulation -> loosened tolerance vs f32 ref.
    assert jnp.allclose(out, ref, atol=2e-2, rtol=2e-2), \
        float(jnp.max(jnp.abs(out - ref)))
    print("KERNEL_OK")
</pallas_src>

<mosaic_0001>
module attributes {stable_mosaic.version = 11 : i64} {
  func.func @_patch_embed_kernel(%arg0: i32, %arg1: i32, %arg2: memref<32x512xbf16, #tpu.memory_space<vmem>>, %arg3: memref<512x32xbf16, #tpu.memory_space<vmem>>, %arg4: memref<1x32xf32, #tpu.memory_space<vmem>>, %arg5: memref<32x32xf32, #tpu.memory_space<vmem>>) attributes {dimension_semantics = [#tpu.dimension_semantics<parallel>, #tpu.dimension_semantics<parallel>], iteration_bounds = array<i64: 1, 1>, scalar_prefetch = 0 : i64, scratch_operands = 0 : i64, tpu.core_type = #tpu.core_type<tc>, window_params = [{transform_indices = @transform_0, window_bounds = array<i64: 32, 512>}, {transform_indices = @transform_1, window_bounds = array<i64: 512, 32>}, {transform_indices = @transform_2, window_bounds = array<i64: 1, 32>}, {transform_indices = @transform_3, window_bounds = array<i64: 32, 32>}]} {
    %c0 = arith.constant 0 : index
    %c0_0 = arith.constant 0 : index
    %0 = vector.load %arg2[%c0, %c0_0] : memref<32x512xbf16, #tpu.memory_space<vmem>>, vector<32x512xbf16>
    %c0_1 = arith.constant 0 : index
    %c0_2 = arith.constant 0 : index
    %1 = vector.load %arg3[%c0_1, %c0_2] : memref<512x32xbf16, #tpu.memory_space<vmem>>, vector<512x32xbf16>
    %cst = arith.constant dense<0.000000e+00> : vector<32x32xf32>
    %2 = tpu.matmul %0, %1, %cst {dimension_numbers = #tpu.dot_dimension_numbers<[1], [0], [0], [1], [0, 0, 1, 1], [], []>} : vector<32x512xbf16>, vector<512x32xbf16>, vector<32x32xf32> -> vector<32x32xf32>
    %c0_3 = arith.constant 0 : index
    %c0_4 = arith.constant 0 : index
    %3 = vector.load %arg4[%c0_3, %c0_4] : memref<1x32xf32, #tpu.memory_space<vmem>>, vector<1x32xf32>
    %4 = vector.broadcast %3 : vector<1x32xf32> to vector<32x32xf32>
    %5 = arith.addf %2, %4 : vector<32x32xf32>
    %c0_5 = arith.constant 0 : index
    %c0_6 = arith.constant 0 : index
    %6 = vector.load %arg5[%c0_5, %c0_6] : memref<32x32xf32, #tpu.memory_space<vmem>>, vector<32x32xf32>
    tpu.vector_store %arg5[%c0_5, %c0_6], %5 {strides = array<i32>} : memref<32x32xf32, #tpu.memory_space<vmem>>, vector<32x32xf32>,
    return
  }
  func.func @transform_0(%arg0: i32, %arg1: i32) -> (i32, i32) {
    %c0_i32 = arith.constant 0 : i32
    %c0_i32_0 = arith.constant 0 : i32
    return %arg1, %c0_i32 : i32, i32
  }
  func.func @transform_1(%arg0: i32, %arg1: i32) -> (i32, i32) {
    %c0_i32 = arith.constant 0 : i32
    %c0_i32_0 = arith.constant 0 : i32
    return %c0_i32, %arg0 : i32, i32
  }
  func.func @transform_2(%arg0: i32, %arg1: i32) -> (i32, i32) {
    %c0_i32 = arith.constant 0 : i32
    %c0_i32_0 = arith.constant 0 : i32
    return %c0_i32, %arg0 : i32, i32
  }
  func.func @transform_3(%arg0: i32, %arg1: i32) -> (i32, i32) {
    %c0_i32 = arith.constant 0 : i32
    return %arg1, %arg0 : i32, i32
  }
}

</mosaic_0001>

<bundles_post_ra>
// kernel: patch_embed_3d.1
= control target key start
LH: loop header
LB: loop body
LE: loop exit
PB: predicated region body
PF: predicated region fallthrough
CT: control target
= control target key end

     0   :  { %s776_s0 = inlined_call_operand.vmem [shape: bf16[32,512], index: 0, kind: input, shape index: {}]   ;;  %s777_s1 = inlined_call_operand.vmem [shape: bf16[512,32], index: 1, kind: input, shape index: {}]   ;;  %s778_s2 = inlined_call_operand.vmem [shape: f32[1,32], index: 2, kind: input, shape index: {}]   ;;  %s779_s3 = inlined_call_operand.hbm [shape: f32[32,32], index: 3, kind: output, shape index: {}]  }
   0x1   :  { %v546_v0 = vld [vmem:[%s777_s1 + $0x40] sm:$0xff]   ;;  %v550_v4 = vld [vmem:[%s777_s1 + $0x48] sm:$0xff]   ;;  %v554_v8 = vld [vmem:[%s777_s1 + $0x50] sm:$0xff]  }
   0x2   :  { %v547_v1 = vld [vmem:[%s777_s1 + $0xc0] sm:$0xff]   ;;  %487 = vmatprep.subr.bf16.mxu0 %v546_v0  ;;  %v551_v5 = vld [vmem:[%s777_s1 + $0xc8] sm:$0xff]   ;;  %v555_v9 = vld [vmem:[%s777_s1 + $0xd0] sm:$0xff]  }
   0x3   :  { %v548_v2 = vld [vmem:[%s777_s1] sm:$0xff]   ;;  %515 = vmatprep.subr.bf16.mxu1 %v547_v1  ;;  %v552_v6 = vld [vmem:[%s777_s1 + $0x8] sm:$0xff]   ;;  %v556_v10 = vld [vmem:[%s777_s1 + $0x10] sm:$0xff]  }
   0x4   :  { %v549_v3 = vld [vmem:[%s777_s1 + $0x80] sm:$0xff]   ;;  %488 = vmatpush3.bf16.msra.mxu0 %v548_v2  ;;  %v553_v7 = vld [vmem:[%s777_s1 + $0x88] sm:$0xff]   ;;  %v557_v11 = vld [vmem:[%s777_s1 + $0x90] sm:$0xff]  }
   0x5   :  { %516 = vmatpush3.bf16.msra.mxu1 %v549_v3  ;;  %489 = vmatprep.subr.bf16.mxu0 %v550_v4  ;;  %v558_v12 = vld [vmem:[%s777_s1 + $0x58] sm:$0xff]   ;;  %v562_v16 = vld [vmem:[%s777_s1 + $0x60] sm:$0xff]   ;;  %v566_v20 = vld [vmem:[%s777_s1 + $0x68] sm:$0xff]  }
   0x6   :  { %517 = vmatprep.subr.bf16.mxu1 %v551_v5  ;;  %v559_v13 = vld [vmem:[%s777_s1 + $0xd8] sm:$0xff]   ;;  %v563_v17 = vld [vmem:[%s777_s1 + $0xe0] sm:$0xff]   ;;  %v567_v21 = vld [vmem:[%s777_s1 + $0xe8] sm:$0xff]  }
   0x7   :  { %v560_v14 = vld [vmem:[%s777_s1 + $0x18] sm:$0xff]   ;;  %v564_v18 = vld [vmem:[%s777_s1 + $0x20] sm:$0xff]   ;;  %v568_v22 = vld [vmem:[%s777_s1 + $0x28] sm:$0xff]  }
   0x8   :  { %490 = vmatpush3.bf16.msra.mxu0 %v552_v6  ;;  %v561_v15 = vld [vmem:[%s777_s1 + $0x98] sm:$0xff]   ;;  %v565_v19 = vld [vmem:[%s777_s1 + $0xa0] sm:$0xff]   ;;  %v569_v23 = vld [vmem:[%s777_s1 + $0xa8] sm:$0xff]  }
   0x9   :  { %518 = vmatpush3.bf16.msra.mxu1 %v553_v7  ;;  %491 = vmatprep.subr.bf16.mxu0 %v554_v8  ;;  %v570_v24 = vld [vmem:[%s777_s1 + $0x70] sm:$0xff]   ;;  %v574_v28 = vld [vmem:[%s777_s1 + $0x78] sm:$0xff]  }
   0xa   :  { %519 = vmatprep.subr.bf16.mxu1 %v555_v9  ;;  %v571_v25 = vld [vmem:[%s777_s1 + $0xf0] sm:$0xff]   ;;  %v575_v29 = vld [vmem:[%s777_s1 + $0xf8] sm:$0xff]  }
   0xb   :  { %v572_v26 = vld [vmem:[%s777_s1 + $0x30] sm:$0xff]   ;;  %v576_v30 = vld [vmem:[%s777_s1 + $0x38] sm:$0xff]  }
   0xc   :  { %492 = vmatpush3.bf16.msra.mxu0 %v556_v10  ;;  %v573_v27 = vld [vmem:[%s777_s1 + $0xb0] sm:$0xff]   ;;  %v577_v31 = vld [vmem:[%s777_s1 + $0xb8] sm:$0xff]  }
   0xd   :  { %520 = vmatpush3.bf16.msra.mxu1 %v557_v11  ;;  %493 = vmatprep.subr.bf16.mxu0 %v558_v12  ;;  %v578_v32 = vld [vmem:[%s776_s0] ss:$16 sps:$4 sm:$0xff]   ;;  %v580_v33 = vld [vmem:[%s776_s0 + $0x4] ss:$16 sps:$4 sm:$0xff]   ;;  %v581_v34 = vld [vmem:[%s776_s0 + $0x8] ss:$16 sps:$4 sm:$0xff]  }
   0xe   :  { %521 = vmatprep.subr.bf16.mxu1 %v559_v13  ;;  %v583_v35 = vld [vmem:[%s776_s0 + $0xc] ss:$16 sps:$4 sm:$0xff]   ;;  %359 = vmatprep.mubr.bf16.mxu0 %v580_v33  ;;  %v584_v36 = vld [vmem:[%s776_s0 + $0x24] ss:$16 sps:$4 sm:$0xff]  }
   0xf   :  { %408 = vmatprep.mubr.bf16.mxu1 %v583_v35  ;;  %v586_v37 = vld [vmem:[%s776_s0 + $0x2c] ss:$16 sps:$4 sm:$0xff]  }
  0x10   :  { %494 = vmatpush3.bf16.msra.mxu0 %v560_v14 }
  0x11   :  { %522 = vmatpush3.bf16.msra.mxu1 %v561_v15  ;;  %495 = vmatprep.subr.bf16.mxu0 %v562_v16 }
  0x12   :  { %523 = vmatprep.subr.bf16.mxu1 %v563_v17 }
  0x14   :  { %496 = vmatpush3.bf16.msra.mxu0 %v564_v18 }
  0x15   :  { %524 = vmatpush3.bf16.msra.mxu1 %v565_v19  ;;  %497 = vmatprep.subr.bf16.mxu0 %v566_v20 }
  0x16   :  { %525 = vmatprep.subr.bf16.mxu1 %v567_v21 }
  0x18   :  { %498 = vmatpush3.bf16.msra.mxu0 %v568_v22 }
  0x19   :  { %526 = vmatpush3.bf16.msra.mxu1 %v569_v23  ;;  %499 = vmatprep.subr.bf16.mxu0 %v570_v24 }
  0x1a   :  { %527 = vmatprep.subr.bf16.mxu1 %v571_v25 }
  0x1c   :  { %500 = vmatpush3.bf16.msra.mxu0 %v572_v26 }
  0x1d   :  { %528 = vmatpush3.bf16.msra.mxu1 %v573_v27  ;;  %501 = vmatprep.subr.bf16.mxu0 %v574_v28 }
  0x1e   :  { %529 = vmatprep.subr.bf16.mxu1 %v575_v29 }
  0x20   :  { %502 = vmatpush3.bf16.msra.mxu0 %v576_v30 }
  0x21   :  { %530 = vmatpush3.bf16.msra.mxu1 %v577_v31 }
  0x23   :  { %360 = vmatmul.mubr.bf16.vlgmr.msra.gmra.mrb[0].mxu0 %v578_v32 }
  0x24   :  { %409 = vmatmul.mubr.bf16.vlgmr.msra.gmra.mrb[0].mxu1 %v581_v34  ;;  %367 = vmatprep.mubr.bf16.mxu0 %v584_v36 }
  0x25   :  { %8 = vsyncpa [#allocation3], 0  ;;  %416 = vmatprep.mubr.bf16.mxu1 %v586_v37  ;;  %v588_v38 = vld [vmem:[%s776_s0 + $0x20] ss:$16 sps:$4 sm:$0xff]   ;;  %v589_v39 = vld [vmem:[%s776_s0 + $0x28] ss:$16 sps:$4 sm:$0xff]  }
  0x26   :  { %v446_v42 = vld [vmem:[%s778_s2] ss:$0 sm:$0xff]  ;;  %vm425_vm0 = vcmask 261120   ;;  %s614_s0 = smov [#allocation2]  }
  0x27   :  { %s435_s2 = sshll.u32 %s614_s0, 4  ;;  %s436_s2 = int_to_ptr.vmem [resolvable:$true] %s435_s2 }
  0x28   :  { %s590_s12 = scalar_lea.vmem %s436_s2, 512  ;;  %p595_p1 = scmp.lt.s32.totalorder %s436_s2, %s436_s2 }
  0x29   :  { %p591_p0 = scmp.ne.s32.totalorder %s436_s2, %s590_s12  ;;  %p596_p2 = scmp.lt.s32.totalorder %s590_s12, %s590_s12 }
  0x2b   :  { %368 = vmatmul.mubr.bf16.gmra.mrb[4].mxu0 %v588_v38  ;;  %p597_p3 = por %p596_p2, %p595_p1 }
  0x2c   :  { %417 = vmatmul.mubr.bf16.gmra.mrb[4].mxu1 %v589_v39 }
  0x2d   :  { %p598_p4 = pnand %p597_p3, %p591_p0 }
  0xf6   :  { %v503_v40 = vpop.f32.mrb[0].mxu0 }
  0xf7   :  { %v531_v41 = vpop.f32.mrb[0].mxu1  ;;  %v504_v43 = vpop.f32.mrb[1].mxu0 }
  0xf8   :  { %v505_v44 = vadd.f32 %v504_v43, %v503_v40  ;;  %v532_v45 = vpop.f32.mrb[1].mxu1  ;;  %v506_v46 = vpop.f32.mrb[2].mxu0 }
  0xf9   :  { %v533_v47 = vadd.f32 %v532_v45, %v531_v41  ;;  %v534_v48 = vpop.f32.mrb[2].mxu1  ;;  %v507_v49 = vpop.f32.mrb[3].mxu0 }
  0xfa   :  { %v362_v50 = vadd.f32 %v505_v44, %v446_v42  ;;  %v508_v51 = vadd.f32 %v507_v49, %v506_v46  ;;  %v535_v52 = vpop.f32.mrb[3].mxu1 }
  0xfb   :  { %v536_v53 = vadd.f32 %v535_v52, %v534_v48 }
  0xfc   :  { %v411_v54 = vadd.f32 %v533_v47, %v362_v50  ;;  %v365_v55 = vadd.f32 %v508_v51, %v446_v42 }
  0xfe   :  { %426 = vst.msk [vmem:[#allocation2] sm:$0xff] %vm425_vm0, %v411_v54  ;;  %v414_v56 = vadd.f32 %v536_v53, %v365_v55  ;;  %v509_v57 = vpop.f32.mrb[4].mxu0 }
  0xff   :  { %v537_v58 = vpop.f32.mrb[4].mxu1  ;;  %v510_v59 = vpop.f32.mrb[5].mxu0 }
 0x100   :  { %427 = vst.msk [vmem:[#allocation2 + $0x8] sm:$0xff] %vm425_vm0, %v414_v56  ;;  %v511_v60 = vadd.f32 %v510_v59, %v509_v57  ;;  %v538_v61 = vpop.f32.mrb[5].mxu1  ;;  %v512_v62 = vpop.f32.mrb[6].mxu0 }
 0x101   :  { %v539_v63 = vadd.f32 %v538_v61, %v537_v58  ;;  %v540_v0 = vpop.f32.mrb[6].mxu1  ;;  %v513_v1 = vpop.f32.mrb[7].mxu0 }
 0x102   :  { %v370_v2 = vadd.f32 %v511_v60, %v446_v42  ;;  %v514_v3 = vadd.f32 %v513_v1, %v512_v62  ;;  %v541_v4 = vpop.f32.mrb[7].mxu1 }
 0x103   :  { %v542_v5 = vadd.f32 %v541_v4, %v540_v0 }
 0x104   :  { %v419_v6 = vadd.f32 %v539_v63, %v370_v2  ;;  %v373_v7 = vadd.f32 %v514_v3, %v446_v42 }
 0x106   :  { %428 = vst.msk [vmem:[#allocation2 + $0x10] sm:$0xff] %vm425_vm0, %v419_v6  ;;  %v422_v8 = vadd.f32 %v542_v5, %v373_v7 }
 0x108   :  { %429 = vst.msk [vmem:[#allocation2 + $0x18] sm:$0xff] %vm425_vm0, %v422_v8 }
 0x109   :  { %601 = shalt.err (!%p598_p4)
}
 0x10a   :  { %s602_s15 = scalar_lea.hbm %s779_s3, 512 }
 0x10b   :  { %p603_p5 = scmp.ne.s32.totalorder %s779_s3, %s602_s15  ;;  %p606_p6 = scmp.lt.u32.totalorder %s602_s15, %s779_s3 }
 0x10d   :  { %p608_p7 = pnand %p606_p6, %p603_p5 }
 0x10f   :  { %611 = shalt.err (!%p608_p7)
}
 0x110   :  { %s615_s20 = smov 128   ;;  %s616_s21 = smov 8  }
 0x111   :  { %441 = dma.vmem_to_hbm [thread:$0]  %s436_s2, 512, %s779_s3, [#allocation3], %s615_s20, %s615_s20, %s616_s21  }
 0x112   :  { %612 = dma.done.wait [#allocation3], 512  }
 0x113   :  { %613 = vsyncadd [#allocation3], 4294966784 }
 0x114   :  { %445 = vsyncpa [#allocation3], 1 }

</bundles_post_ra>
